<compile_context>
chip_gen: v7x
topology: tpu7x:2x2x1
jax: 0.10.0
libtpu: 0.0.40
codegen_flags: <defaults>
</compile_context>

<pallas_src>
import functools

import jax
import jax.numpy as jnp
from jax import lax
from jax.experimental import pallas as pl
from jax.experimental.pallas import tpu as pltpu

LN_EPS = 1e-5  # torch.nn.LayerNorm default


# ---------------------------------------------------------------------------
# Counter-based hash RNG (for dropout): murmur3-style finalizer on int32 lanes.
# ---------------------------------------------------------------------------
def _as_i32(c):
    c &= 0xFFFFFFFF
    return c - (1 << 32) if c >= (1 << 31) else c


_K_ROW = _as_i32(0x9E3779B1)
_K_COL = _as_i32(0x85EBCA77)
_K_SEED = _as_i32(0xC2B2AE3D)
_M1 = _as_i32(0x85EBCA6B)
_M2 = _as_i32(0xC2B2AE35)


def _mix32(v):
    """murmur3 finalizer (wraparound int32 multiplies are fine for hashing)."""
    v = v ^ lax.shift_right_logical(v, jnp.int32(16))
    v = v * jnp.int32(_M1)
    v = v ^ lax.shift_right_logical(v, jnp.int32(13))
    v = v * jnp.int32(_M2)
    v = v ^ lax.shift_right_logical(v, jnp.int32(16))
    return v


# ---------------------------------------------------------------------------
# Kernel
# ---------------------------------------------------------------------------
def _sublayer_connection_kernel(seed_ref,                      # scalar prefetch (SMEM)
                                x_ref, ln_ref, w_ref, b_ref,   # inputs
                                o_ref,                         # output
                                y_scr,                         # VMEM scratch (normalized x, bf16)
                                *, n_col, dropout_p, training):
    j = pl.program_id(1)

    # ---- LayerNorm once per row tile (j == 0), cached in VMEM scratch as bf16 ----
    @pl.when(j == 0)
    def _():
        x = x_ref[...].astype(jnp.float32)                      # (TM, H)
        # One-pass stats: two *independent* lane reductions (shorter XLU chain, one less
        # elementwise pass than mean -> center -> mean(center^2)).
        mean = jnp.mean(x, axis=-1, keepdims=True)
        mean_sq = jnp.mean(x * x, axis=-1, keepdims=True)
        var = jnp.maximum(mean_sq - mean * mean, 0.0)
        y = (x - mean) * lax.rsqrt(var + LN_EPS)
        y = y * ln_ref[0:1, :] + ln_ref[1:2, :]                 # gamma, beta
        y_scr[...] = y.astype(jnp.bfloat16)                     # deliberate bf16 MXU operand

    # ---- Sublayer: Linear(H -> TN) on the MXU (bf16 operands, f32 accumulation) ----
    z = jnp.dot(y_scr[...], w_ref[...], preferred_element_type=jnp.float32)
    z = z + b_ref[...]                                          # (1, TN) broadcasts

    tm, tn = z.shape

    # ---- Dropout (inverted dropout, torch training semantics) ----
    if training and dropout_p >= 1.0:
        z = jnp.zeros_like(z)                                   # p == 1: drop everything, no inf scale
    elif training and dropout_p > 0.0:
        row0 = pl.program_id(0) * tm
        col0 = j * tn
        r = lax.broadcasted_iota(jnp.int32, z.shape, 0) + row0  # global row index
        c = lax.broadcasted_iota(jnp.int32, z.shape, 1) + col0  # global col index
        seed = seed_ref[0]
        v = (r * jnp.int32(_K_ROW)) ^ (c * jnp.int32(_K_COL)) ^ (seed * jnp.int32(_K_SEED))
        v = _mix32(v)
        n_drop = min(int(round(dropout_p * float(1 << 24))), 1 << 24)
        keep = (v & jnp.int32(0x00FFFFFF)) >= jnp.int32(n_drop)  # 24-bit uniform keep test
        z = jnp.where(keep, z * jnp.float32(1.0 / (1.0 - dropout_p)), 0.0)

    # ---- Residual connection (x columns matching this output column tile) ----
    if n_col == 1:
        x_res = x_ref[...]
    else:
        c0 = pl.multiple_of(j * tn, 128)
        x_res = x_ref[:, pl.ds(c0, tn)]
    o_ref[...] = (x_res.astype(jnp.float32) + z).astype(o_ref.dtype)


# ---------------------------------------------------------------------------
# Wrapper
# ---------------------------------------------------------------------------
def _pick_vmem_limit():
    """~80% of physical VMEM (v7x: ~51 MiB, v5e/v6e: ~102 MiB); safe fallback otherwise."""
    try:
        cap = pltpu.get_tpu_info().vmem_capacity_bytes
        return int(cap * 0.8)
    except Exception:
        return 64 * 1024 * 1024


def sublayer_connection(x, gamma, beta, w, b, *, dropout_p=0.1, training=True, seed=0):
    """x: (B, S, H) float32.  Returns x + dropout(Linear(LayerNorm(x)))."""
    B, S, H = x.shape
    rows = B * S
    x2 = x.reshape(rows, H)

    vmem_limit = _pick_vmem_limit()
    budget = int(vmem_limit * 0.75)          # planning budget, headroom for compiler scratch

    # ---- W residency: fully resident (single-buffered) or streamed in column tiles ----
    w_bytes = 2 * H * H                      # bf16
    if w_bytes <= budget // 3 or (H % 128) != 0:
        tile_n, n_col = H, 1
    else:
        tile_n, n_col = 128, H // 128        # safe fallback
        for cand in range(2, H // 128 + 1):
            tn = H // cand
            if H % cand == 0 and tn % 128 == 0 and 2 * 2 * H * tn <= budget // 3:
                tile_n, n_col = tn, cand
                break
    w_buf_count = 1 if n_col == 1 else 2     # resident W is single-buffered

    # ---- H-aware row tile: ~4 MiB per x buffer, capped by VMEM budget and row count ----
    w_foot = 2 * H * tile_n * w_buf_count
    per_row = 4 * H * 2 + 4 * tile_n * 2 + 2 * H   # x (2 bufs) + out (2 bufs) + y scratch (bf16)
    avail = max(budget - w_foot - 16 * H, per_row * 8)
    target_rows = max(8, (4 * 1024 * 1024) // (4 * H))
    tile = min(4096, target_rows, max(avail // per_row, 8))
    tile = max(8, (tile // 8) * 8)
    if rows >= 8:
        tile = min(tile, (rows // 8) * 8)
    else:
        tile = rows
    n_row = -(-rows // tile)                 # ragged tail handled by Pallas boundary clipping

    ln_params = jnp.stack([gamma, beta]).astype(jnp.float32)   # (2, H) resident
    bias2 = b.astype(jnp.float32).reshape(1, H)                # (1, H), column-tiled if needed
    w_bf16 = w.astype(jnp.bfloat16)
    seed_arr = jnp.array([seed], dtype=jnp.int32)

    kernel = functools.partial(_sublayer_connection_kernel, n_col=n_col,
                               dropout_p=float(dropout_p), training=bool(training))

    resident = pl.Buffered(1)                                  # no double-buffer for invariant blocks
    w_mode = resident if n_col == 1 else None

    cost = pl.CostEstimate(
        flops=int(2 * rows * H * H),
        transcendentals=int(rows),
        bytes_accessed=int(2 * 4 * rows * H + 2 * H * H + 12 * H),
    )

    out = pl.pallas_call(
        kernel,
        out_shape=jax.ShapeDtypeStruct((rows, H), x.dtype),
        grid_spec=pltpu.PrefetchScalarGridSpec(
            num_scalar_prefetch=1,
            grid=(n_row, n_col),
            in_specs=[
                pl.BlockSpec((tile, H), lambda i, j, seed: (i, 0)),       # x row tile (resident over j)
                pl.BlockSpec((2, H), lambda i, j, seed: (0, 0),
                             pipeline_mode=resident),                     # gamma/beta
                pl.BlockSpec((H, tile_n), lambda i, j, seed: (0, j),
                             pipeline_mode=w_mode),                       # W (bf16)
                pl.BlockSpec((1, tile_n), lambda i, j, seed: (0, j),
                             pipeline_mode=w_mode),                       # bias
            ],
            out_specs=pl.BlockSpec((tile, tile_n), lambda i, j, seed: (i, j)),
            scratch_shapes=[pltpu.VMEM((tile, H), jnp.bfloat16)],         # normalized x cache
        ),
        compiler_params=pltpu.CompilerParams(
            dimension_semantics=("parallel", "arbitrary"),
            vmem_limit_bytes=vmem_limit,
        ),
        cost_estimate=cost,
    )(seed_arr, x2, ln_params, w_bf16, bias2)

    return out.reshape(B, S, H)


# ---------------------------------------------------------------------------
# Pure-JAX reference (eval mode, mirrors the kernel's bf16 MXU operands)
# ---------------------------------------------------------------------------
def _reference_no_dropout(x, gamma, beta, w, b):
    mean = jnp.mean(x, axis=-1, keepdims=True)
    var = jnp.mean((x - mean) ** 2, axis=-1, keepdims=True)
    y = (x - mean) * lax.rsqrt(var + LN_EPS) * gamma + beta
    z = jnp.einsum("bsh,hk->bsk", y.astype(jnp.bfloat16), w.astype(jnp.bfloat16),
                   preferred_element_type=jnp.float32) + b
    return x + z


if __name__ == "__main__":
    B, S, H = 2, 8, 128
    key = jax.random.PRNGKey(0)
    kx, kw, kb = jax.random.split(key, 3)

    x = jax.random.normal(kx, (B, S, H), dtype=jnp.float32)
    gamma = jnp.ones((H,), dtype=jnp.float32)        # torch LayerNorm default init
    beta = jnp.zeros((H,), dtype=jnp.float32)
    w = jax.random.normal(kw, (H, H), dtype=jnp.float32) * (1.0 / jnp.sqrt(float(H)))
    b = jax.random.normal(kb, (H,), dtype=jnp.float32) * 0.01

    # Eval-mode run (dropout = identity) checked against the pure-JAX reference.
    out_eval = sublayer_connection(x, gamma, beta, w, b, dropout_p=0.1, training=False)
    jax.block_until_ready(out_eval)
    assert out_eval.shape == (B, S, H)
    ref = _reference_no_dropout(x, gamma, beta, w, b)
    assert jnp.allclose(out_eval, ref, atol=5e-3, rtol=5e-3), "eval mismatch vs reference"

    # Training-mode run (dropout active, deterministic given seed).
    out_train = sublayer_connection(x, gamma, beta, w, b, dropout_p=0.1, training=True, seed=1234)
    jax.block_until_ready(out_train)
    assert bool(jnp.all(jnp.isfinite(out_train)))
    drop_frac = float(jnp.mean((out_train == x).astype(jnp.float32)))  # dropped -> out == x exactly
    assert 0.0 < drop_frac < 0.5, f"implausible dropout rate {drop_frac}"

    # Ragged-rows path (rows not a multiple of the tile -> boundary clipping, no pad/copy).
    x_ragged = jax.random.normal(jax.random.PRNGKey(1), (3, 5, H), dtype=jnp.float32)
    out_ragged = sublayer_connection(x_ragged, gamma, beta, w, b, dropout_p=0.1, training=False)
    jax.block_until_ready(out_ragged)
    ref_ragged = _reference_no_dropout(x_ragged, gamma, beta, w, b)
    assert jnp.allclose(out_ragged, ref_ragged, atol=5e-3, rtol=5e-3), "ragged mismatch"

    print("KERNEL_OK")
</pallas_src>

<mosaic_0001>
module attributes {stable_mosaic.version = 11 : i64} {
  func.func @_sublayer_connection_kernel(%arg0: i32, %arg1: i32, %arg2: memref<1xi32, #tpu.memory_space<smem>>, %arg3: memref<16x128xf32, #tpu.memory_space<vmem>>, %arg4: memref<2x128xf32, #tpu.memory_space<vmem>>, %arg5: memref<128x128xbf16, #tpu.memory_space<vmem>>, %arg6: memref<1x128xf32, #tpu.memory_space<vmem>>, %arg7: memref<16x128xf32, #tpu.memory_space<vmem>>, %arg8: memref<16x128xbf16, #tpu.memory_space<vmem>>) attributes {dimension_semantics = [#tpu.dimension_semantics<parallel>, #tpu.dimension_semantics<arbitrary>], iteration_bounds = array<i64: 1, 1>, scalar_prefetch = 1 : i64, scratch_operands = 1 : i64, tpu.core_type = #tpu.core_type<tc>, window_params = [{transform_indices = @transform_0, window_bounds = array<i64: 16, 128>}, {pipeline_mode = #tpu.pipeline_mode<synchronous>, transform_indices = @transform_1, window_bounds = array<i64: 2, 128>}, {pipeline_mode = #tpu.pipeline_mode<synchronous>, transform_indices = @transform_2, window_bounds = array<i64: 128, 128>}, {pipeline_mode = #tpu.pipeline_mode<synchronous>, transform_indices = @transform_3, window_bounds = array<i64: 1, 128>}, {transform_indices = @transform_4, window_bounds = array<i64: 16, 128>}]} {
    %c0_i32 = arith.constant 0 : i32
    %0 = arith.cmpi eq, %arg1, %c0_i32 : i32
    %1 = arith.extui %0 : i1 to i32
    %c0_i32_0 = arith.constant 0 : i32
    %2 = arith.cmpi ne, %1, %c0_i32_0 : i32
    scf.if %2 {
      %c0_10 = arith.constant 0 : index
      %c0_11 = arith.constant 0 : index
      %12 = vector.load %arg3[%c0_10, %c0_11] : memref<16x128xf32, #tpu.memory_space<vmem>>, vector<16x128xf32>
      %cst_12 = arith.constant dense<0.000000e+00> : vector<16xf32>
      %13 = vector.multi_reduction <add>, %12, %cst_12 [1] : vector<16x128xf32> to vector<16xf32>
      %14 = vector.shape_cast %13 : vector<16xf32> to vector<16x1xf32>
      %cst_13 = arith.constant 1.280000e+02 : f32
      %15 = vector.broadcast %cst_13 : f32 to vector<16x1xf32>
      %16 = arith.divf %14, %15 : vector<16x1xf32>
      %17 = arith.mulf %12, %12 : vector<16x128xf32>
      %cst_14 = arith.constant dense<0.000000e+00> : vector<16xf32>
      %18 = vector.multi_reduction <add>, %17, %cst_14 [1] : vector<16x128xf32> to vector<16xf32>
      %19 = vector.shape_cast %18 : vector<16xf32> to vector<16x1xf32>
      %cst_15 = arith.constant 1.280000e+02 : f32
      %20 = vector.broadcast %cst_15 : f32 to vector<16x1xf32>
      %21 = arith.divf %19, %20 : vector<16x1xf32>
      %22 = arith.mulf %16, %16 : vector<16x1xf32>
      %23 = arith.subf %21, %22 : vector<16x1xf32>
      %cst_16 = arith.constant 0.000000e+00 : f32
      %24 = vector.broadcast %cst_16 : f32 to vector<16x1xf32>
      %25 = arith.maximumf %23, %24 : vector<16x1xf32>
      %26 = vector.broadcast %16 : vector<16x1xf32> to vector<16x128xf32>
      %27 = arith.subf %12, %26 : vector<16x128xf32>
      %cst_17 = arith.constant 9.99999974E-6 : f32
      %28 = vector.broadcast %cst_17 : f32 to vector<16x1xf32>
      %29 = arith.addf %25, %28 : vector<16x1xf32>
      %30 = math.rsqrt %29 : vector<16x1xf32>
      %31 = vector.broadcast %30 : vector<16x1xf32> to vector<16x128xf32>
      %32 = arith.mulf %27, %31 : vector<16x128xf32>
      %c0_18 = arith.constant 0 : index
      %c0_19 = arith.constant 0 : index
      %33 = vector.load %arg4[%c0_18, %c0_19] : memref<2x128xf32, #tpu.memory_space<vmem>>, vector<1x128xf32>
      %34 = vector.broadcast %33 : vector<1x128xf32> to vector<16x128xf32>
      %35 = arith.mulf %32, %34 : vector<16x128xf32>
      %c1 = arith.constant 1 : index
      %c0_20 = arith.constant 0 : index
      %36 = vector.load %arg4[%c1, %c0_20] : memref<2x128xf32, #tpu.memory_space<vmem>>, vector<1x128xf32>
      %37 = vector.broadcast %36 : vector<1x128xf32> to vector<16x128xf32>
      %38 = arith.addf %35, %37 : vector<16x128xf32>
      %39 = arith.truncf %38 : vector<16x128xf32> to vector<16x128xbf16>
      %c0_21 = arith.constant 0 : index
      %c0_22 = arith.constant 0 : index
      %40 = vector.load %arg8[%c0_21, %c0_22] : memref<16x128xbf16, #tpu.memory_space<vmem>>, vector<16x128xbf16>
      tpu.vector_store %arg8[%c0_21, %c0_22], %39 {strides = array<i32>} : memref<16x128xbf16, #tpu.memory_space<vmem>>, vector<16x128xbf16>,
    } else {
    }
    %c0 = arith.constant 0 : index
    %c0_1 = arith.constant 0 : index
    %3 = vector.load %arg8[%c0, %c0_1] : memref<16x128xbf16, #tpu.memory_space<vmem>>, vector<16x128xbf16>
    %c0_2 = arith.constant 0 : index
    %c0_3 = arith.constant 0 : index
    %4 = vector.load %arg5[%c0_2, %c0_3] : memref<128x128xbf16, #tpu.memory_space<vmem>>, vector<128x128xbf16>
    %cst = arith.constant dense<0.000000e+00> : vector<16x128xf32>
    %5 = tpu.matmul %3, %4, %cst {dimension_numbers = #tpu.dot_dimension_numbers<[1], [0], [0], [1], [0, 0, 1, 1], [], []>} : vector<16x128xbf16>, vector<128x128xbf16>, vector<16x128xf32> -> vector<16x128xf32>
    %c0_4 = arith.constant 0 : index
    %c0_5 = arith.constant 0 : index
    %6 = vector.load %arg6[%c0_4, %c0_5] : memref<1x128xf32, #tpu.memory_space<vmem>>, vector<1x128xf32>
    %7 = vector.broadcast %6 : vector<1x128xf32> to vector<16x128xf32>
    %8 = arith.addf %5, %7 : vector<16x128xf32>
    %c0_6 = arith.constant 0 : index
    %c0_7 = arith.constant 0 : index
    %9 = vector.load %arg3[%c0_6, %c0_7] : memref<16x128xf32, #tpu.memory_space<vmem>>, vector<16x128xf32>
    %10 = arith.addf %9, %8 : vector<16x128xf32>
    %c0_8 = arith.constant 0 : index
    %c0_9 = arith.constant 0 : index
    %11 = vector.load %arg7[%c0_8, %c0_9] : memref<16x128xf32, #tpu.memory_space<vmem>>, vector<16x128xf32>
    tpu.vector_store %arg7[%c0_8, %c0_9], %10 {strides = array<i32>} : memref<16x128xf32, #tpu.memory_space<vmem>>, vector<16x128xf32>,
    return
  }
  func.func @transform_0(%arg0: i32, %arg1: i32, %arg2: memref<1xi32, #tpu.memory_space<smem>>) -> (i32, i32) {
    %c0_i32 = arith.constant 0 : i32
    %c0_i32_0 = arith.constant 0 : i32
    return %arg0, %c0_i32 : i32, i32
  }
  func.func @transform_1(%arg0: i32, %arg1: i32, %arg2: memref<1xi32, #tpu.memory_space<smem>>) -> (i32, i32) {
    %c0_i32 = arith.constant 0 : i32
    %c0_i32_0 = arith.constant 0 : i32
    %c0_i32_1 = arith.constant 0 : i32
    return %c0_i32, %c0_i32_0 : i32, i32
  }
  func.func @transform_2(%arg0: i32, %arg1: i32, %arg2: memref<1xi32, #tpu.memory_space<smem>>) -> (i32, i32) {
    %c0_i32 = arith.constant 0 : i32
    %c0_i32_0 = arith.constant 0 : i32
    return %c0_i32, %arg1 : i32, i32
  }
  func.func @transform_3(%arg0: i32, %arg1: i32, %arg2: memref<1xi32, #tpu.memory_space<smem>>) -> (i32, i32) {
    %c0_i32 = arith.constant 0 : i32
    %c0_i32_0 = arith.constant 0 : i32
    return %c0_i32, %arg1 : i32, i32
  }
  func.func @transform_4(%arg0: i32, %arg1: i32, %arg2: memref<1xi32, #tpu.memory_space<smem>>) -> (i32, i32) {
    %c0_i32 = arith.constant 0 : i32
    return %arg0, %arg1 : i32, i32
  }
}

</mosaic_0001>

<bundles_post_ra>
// kernel: tpu_custom_call.1
= control target key start
LH: loop header
LB: loop body
LE: loop exit
PB: predicated region body
PF: predicated region fallthrough
CT: control target
= control target key end

     0   :  { %11 = vsyncpa [#allocation6], 0  ;;  %s570_s0 = inlined_call_operand.<no memory space> [shape: s32[1], index: 0, kind: input, shape index: {}]   ;;  %s571_s1 = inlined_call_operand.hbm [shape: f32[16,128], index: 1, kind: input, shape index: {}]   ;;  %s572_s2 = inlined_call_operand.hbm [shape: f32[2,128], index: 2, kind: input, shape index: {}]   ;;  %s573_s3 = inlined_call_operand.hbm [shape: bf16[128,128], index: 3, kind: input, shape index: {}]   ;;  %s574_s4 = inlined_call_operand.hbm [shape: f32[1,128], index: 4, kind: input, shape index: {}]   ;;  %s575_s5 = inlined_call_operand.hbm [shape: f32[16,128], index: 5, kind: output, shape index: {}]  }
   0x1   :  { %12 = vsyncpa [#allocation9], 0 }
   0x2   :  { %13 = vsyncpa [#allocation12], 0 }
   0x3   :  { %14 = vsyncpa [#allocation7], 0  ;;  %s442_s0 = smov [#allocation8]   ;;  %s443_s19 = smov [#allocation5]  }
   0x4   :  { %s33_s18 = sshll.u32 %s442_s0, 4  ;;  %s20_s20 = sshll.u32 %s443_s19, 4  ;;  %s34_s18 = int_to_ptr.vmem [resolvable:$true] %s33_s18  ;;  %s483_s20 = int_to_ptr.vmem [resolvable:$true] %s20_s20 }
   0x5   :  { %s324_s23 = scalar_lea.hbm %s572_s2, 32 }
   0x6   :  { %p325_p0 = scmp.ne.s32.totalorder %s572_s2, %s324_s23  ;;  %p328_p1 = scmp.lt.u32.totalorder %s324_s23, %s572_s2 }
   0x8   :  { %p330_p2 = pnand %p328_p1, %p325_p0 }
   0xa   :  { %333 = shalt.err (!%p330_p2)
}
   0xb   :  { %s334_s28 = scalar_lea.vmem %s34_s18, 32  ;;  %p339_p4 = scmp.lt.s32.totalorder %s34_s18, %s34_s18 }
   0xc   :  { %p335_p3 = scmp.ne.s32.totalorder %s34_s18, %s334_s28  ;;  %p340_p5 = scmp.lt.s32.totalorder %s334_s28, %s334_s28 }
   0xe   :  { %p341_p6 = por %p340_p5, %p339_p4 }
  0x10   :  { %p342_p7 = pnand %p341_p6, %p335_p3 }
  0x12   :  { %345 = shalt.err (!%p342_p7)
}
  0x13   :  { %36 = dma.hbm_to_vmem [thread:$0]  %s572_s2, 32, %s34_s18, [#allocation9]  }
  0x14   :  { %s346_s8 = scalar_lea.hbm %s571_s1, 256 }
  0x15   :  { %p347_p8 = scmp.ne.s32.totalorder %s571_s1, %s346_s8  ;;  %p350_p9 = scmp.lt.u32.totalorder %s346_s8, %s571_s1 }
  0x17   :  { %p352_p10 = pnand %p350_p9, %p347_p8 }
  0x19   :  { %355 = shalt.err (!%p352_p10)
}
  0x1a   :  { %s356_s13 = scalar_lea.vmem %s483_s20, 256  ;;  %p361_p12 = scmp.lt.s32.totalorder %s483_s20, %s483_s20 }
  0x1b   :  { %p357_p11 = scmp.ne.s32.totalorder %s483_s20, %s356_s13  ;;  %p362_p13 = scmp.lt.s32.totalorder %s356_s13, %s356_s13 }
  0x1d   :  { %p363_p0 = por %p362_p13, %p361_p12 }
  0x1f   :  { %p364_p1 = pnand %p363_p0, %p357_p11 }
  0x21   :  { %367 = shalt.err (!%p364_p1)
}
  0x22   :  { %s444_s2 = smov 128   ;;  %s445_s14 = smov 8  }
  0x23   :  { %26 = dma.hbm_to_vmem [thread:$0]  %s571_s1, 256, %s483_s20, [#allocation6], %s444_s2, %s444_s2, %s445_s14  }
  0x24   :  { %s446_s17 = smov [#allocation10]   ;;  %s368_s21 = scalar_lea.hbm %s573_s3, 1024 }
  0x25   :  { %s42_s0 = sshll.u32 %s446_s17, 4  ;;  %p369_p2 = scmp.ne.s32.totalorder %s573_s3, %s368_s21  ;;  %s43_s0 = int_to_ptr.vmem [resolvable:$true] %s42_s0 }
  0x26   :  { %p372_p3 = scmp.lt.u32.totalorder %s368_s21, %s573_s3 }
  0x28   :  { %p374_p4 = pnand %p372_p3, %p369_p2 }
  0x2a   :  { %377 = shalt.err (!%p374_p4)
}
  0x2b   :  { %s378_s26 = scalar_lea.vmem %s43_s0, 1024  ;;  %p383_p6 = scmp.lt.s32.totalorder %s43_s0, %s43_s0 }
  0x2c   :  { %p379_p5 = scmp.ne.s32.totalorder %s43_s0, %s378_s26  ;;  %p384_p7 = scmp.lt.s32.totalorder %s378_s26, %s378_s26 }
  0x2e   :  { %p385_p8 = por %p384_p7, %p383_p6 }
  0x30   :  { %p386_p9 = pnand %p385_p8, %p379_p5 }
  0x32   :  { %389 = shalt.err (!%p386_p9)
}
  0x33   :  { %s447_s1 = smov 64   ;;  %s448_s20 = smov 4  }
  0x34   :  { %48 = dma.hbm_to_vmem [thread:$0]  %s573_s3, 1024, %s43_s0, [#allocation9], %s447_s1, %s447_s1, %s448_s20  }
  0x35   :  { %s449_s29 = smov [#allocation11]   ;;  %s390_s8 = scalar_lea.hbm %s574_s4, 16 }
  0x36   :  { %s55_s30 = sshll.u32 %s449_s29, 4  ;;  %p391_p10 = scmp.ne.s32.totalorder %s574_s4, %s390_s8  ;;  %s56_s30 = int_to_ptr.vmem [resolvable:$true] %s55_s30 }
  0x37   :  { %p394_p11 = scmp.lt.u32.totalorder %s390_s8, %s574_s4 }
  0x39   :  { %p396_p12 = pnand %p394_p11, %p391_p10 }
  0x3b   :  { %399 = shalt.err (!%p396_p12)
}
  0x3c   :  { %s400_s13 = scalar_lea.vmem %s56_s30, 16  ;;  %s404_s3 = scalar_lea.vmem %s56_s30, 32 }
  0x3d   :  { %p401_p13 = scmp.ne.s32.totalorder %s56_s30, %s400_s13  ;;  %p405_p0 = scmp.lt.s32.totalorder %s56_s30, %s56_s30 }
  0x3e   :  { %p406_p1 = scmp.lt.s32.totalorder %s404_s3, %s400_s13 }
  0x40   :  { %p407_p2 = por %p406_p1, %p405_p0 }
  0x42   :  { %p408_p3 = pnand %p407_p2, %p401_p13 }
  0x44   :  { %411 = shalt.err (!%p408_p3)
}
  0x45   :  { %58 = dma.hbm_to_vmem [thread:$0]  %s574_s4, 16, %s56_s30, [#allocation12]  }
  0x46   :  { %434 = dma.done.wait [#allocation6], 256  }
  0x47   :  { %435 = vsyncadd [#allocation6], 4294967040 }
  0x48   :  { %436 = dma.done.wait [#allocation9], 1056  }
  0x49   :  { %437 = vsyncadd [#allocation9], 4294966240 }
  0x4a   :  { %438 = dma.done.wait [#allocation12], 16  }
  0x4b   :  { %439 = vsyncadd [#allocation12], 4294967280  ;;  %v541_v0 = vld [vmem:[#allocation5] sm:$0xff]  ;;  %v543_v1 = vld [vmem:[#allocation5 + $0x8] sm:$0xff]  ;;  %v450_v5 = vmov 0.0   ;;  %vm451_vm0 = vmmov 0  }
  0x4c   :  { %78 = vadd.xlane.f32.xlu0 %v541_v0  ;;  %v85_v2 = vmul.f32 %v541_v0, %v541_v0  ;;  %v86_v3 = vmul.f32 %v543_v1, %v543_v1  ;;  %v312_v4 = vld [vmem:[#allocation10] sm:$0xff]   ;;  %281 = vmatprep.subr.bf16.mxu0 %v450_v5  ;;  %v313_v6 = vld [vmem:[#allocation10 + $0x8] sm:$0xff]   ;;  %v314_v7 = vld [vmem:[#allocation10 + $0x10] sm:$0xff]   ;;  %s452_s4 = smov [#allocation13]  }
  0x4d   :  { %282 = vmatpush3.bf16.msra.mxu0 %v312_v4  ;;  %v315_v8 = vld [vmem:[#allocation10 + $0x18] sm:$0xff]   ;;  %v316_v9 = vld [vmem:[#allocation10 + $0x20] sm:$0xff]   ;;  %297 = vmatprep.mubr.msk.bf16.mxu0 %vm451_vm0, %v450_v5  ;;  %v317_v10 = vld [vmem:[#allocation10 + $0x28] sm:$0xff]   ;;  %s247_s17 = sshll.u32 %s452_s4, 4  ;;  %s248_s17 = int_to_ptr.vmem [resolvable:$true] %s247_s17 }
  0x4e   :  { %87 = vadd.xlane.f32.xlu1 %v85_v2  ;;  %283 = vmatprep.subr.bf16.mxu0 %v450_v5  ;;  %v318_v11 = vld [vmem:[#allocation10 + $0x30] sm:$0xff]   ;;  %v319_v12 = vld [vmem:[#allocation10 + $0x38] sm:$0xff]   ;;  %v263_v42 = vld [vmem:[#allocation11] ss:$0 sm:$0xff]  ;;  %s412_s0 = scalar_lea.vmem %s248_s17, 256  ;;  %p417_p5 = scmp.lt.s32.totalorder %s248_s17, %s248_s17 }
  0x4f   :  { %v261_v32 = vld [vmem:[#allocation8] ss:$0 sm:$0xff]  ;;  %v262_v37 = vld [vmem:[#allocation8 + $0x1] ss:$0 sm:$0xff]  ;;  %p413_p4 = scmp.ne.s32.totalorder %s248_s17, %s412_s0  ;;  %p418_p6 = scmp.lt.s32.totalorder %s412_s0, %s412_s0 }
  0x50   :  { %80 = vadd.xlane.f32.xlu0 %v543_v1 }
  0x51   :  { %284 = vmatpush3.bf16.msra.mxu0 %v313_v6  ;;  %p419_p7 = por %p418_p6, %p417_p5 }
  0x52   :  { %89 = vadd.xlane.f32.xlu1 %v86_v3  ;;  %285 = vmatprep.subr.bf16.mxu0 %v450_v5 }
  0x53   :  { %p420_p8 = pnand %p419_p7, %p413_p4 }
  0x55   :  { %286 = vmatpush3.bf16.msra.mxu0 %v314_v7 }
  0x56   :  { %287 = vmatprep.subr.bf16.mxu0 %v450_v5 }
  0x59   :  { %288 = vmatpush3.bf16.msra.mxu0 %v315_v8 }
  0x5a   :  { %289 = vmatprep.subr.bf16.mxu0 %v450_v5 }
  0x5d   :  { %290 = vmatpush3.bf16.msra.mxu0 %v316_v9 }
  0x5e   :  { %291 = vmatprep.subr.bf16.mxu0 %v450_v5 }
  0x61   :  { %292 = vmatpush3.bf16.msra.mxu0 %v317_v10 }
  0x62   :  { %293 = vmatprep.subr.bf16.mxu0 %v450_v5 }
  0x65   :  { %294 = vmatpush3.bf16.msra.mxu0 %v318_v11 }
  0x66   :  { %295 = vmatprep.subr.bf16.mxu0 %v450_v5 }
  0x69   :  { %296 = vmatpush3.bf16.msra.mxu0 %v319_v12 }
  0xd9   :  { %v79_v13 = vpop.xlane.xlu0 %78 }
  0xda   :  { %v83_v14 = vmul.f32 0.0078125, %v79_v13 }
  0xdb   :  { %v88_v15 = vpop.xlane.xlu1 %87 }
  0xdc   :  { %v93_v16 = vmul.f32 %v83_v14, %v83_v14  ;;  %v91_v17 = vmul.f32 0.0078125, %v88_v15  ;;  %v99_v29 = vsub.f32 %v541_v0, %v83_v14 }
  0xdd   :  { %v81_v18 = vpop.xlane.xlu0 %80 }
  0xde   :  { %v95_v19 = vsub.f32 %v91_v17, %v93_v16  ;;  %v84_v20 = vmul.f32 0.0078125, %v81_v18 }
  0xdf   :  { %v90_v21 = vpop.xlane.xlu1 %89 }
  0xe0   :  { %v97_v22 = vmax.f32 %v95_v19, 0.0  ;;  %v94_v23 = vmul.f32 %v84_v20, %v84_v20  ;;  %v92_v24 = vmul.f32 0.0078125, %v90_v21  ;;  %v100_v33 = vsub.f32 %v543_v1, %v84_v20 }
  0xe2   :  { %v101_v25 = vadd.f32 1e-05, %v97_v22  ;;  %v96_v26 = vsub.f32 %v92_v24, %v94_v23 }
  0xe4   :  { %320 = vrsqrt.f32 %v101_v25  ;;  %v98_v27 = vmax.f32 %v96_v26, 0.0 }
  0xe6   :  { %v102_v28 = vadd.f32 1e-05, %v98_v27 }
  0xe8   :  { %322 = vrsqrt.f32 %v102_v28 }
  0xee   :  { %v321_v30 = vpop.eup %320 }
  0xef   :  { %v105_v31 = vmul.f32 %v321_v30, %v99_v29 }
  0xf1   :  { %v112_v36 = vmul.f32 %v261_v32, %v105_v31 }
  0xf2   :  { %v323_v34 = vpop.eup %322 }
  0xf3   :  { %v106_v35 = vmul.f32 %v323_v34, %v100_v33  ;;  %v119_v39 = vadd.f32 %v262_v37, %v112_v36 }
  0xf5   :  { %v113_v38 = vmul.f32 %v261_v32, %v106_v35 }
  0xf7   :  { %v120_v40 = vadd.f32 %v262_v37, %v113_v38 }
  0xf9   :  { %v121_v41 = vpack.c.bf16 %v120_v40, %v119_v39 }
  0xfb   :  { %298 = vmatmul.mubr.bf16.vlgmr.msra.gmra.mrb[0].mxu0 %v121_v41 }
 0x1ce   :  { %v229_v43 = vpop.f32.mrb[0].mxu0 }
 0x1cf   :  { %v230_v44 = vadd.f32 %v263_v42, %v229_v43  ;;  %v299_v45 = vpop.f32.mrb[1].mxu0 }
 0x1d0   :  { %v232_v46 = vpop.f32.mrb[2].mxu0 }
 0x1d1   :  { %v238_v47 = vadd.f32 %v230_v44, %v541_v0  ;;  %v233_v48 = vadd.f32 %v263_v42, %v232_v46  ;;  %v300_v49 = vpop.f32.mrb[3].mxu0 }
 0x1d3   :  { %240 = vst [vmem:[#allocation13] sm:$0xff] %v238_v47  ;;  %v239_v50 = vadd.f32 %v233_v48, %v543_v1 }
 0x1d5   :  { %241 = vst [vmem:[#allocation13 + $0x8] sm:$0xff] %v239_v50 }
 0x1d6   :  { %423 = shalt.err (!%p420_p8)
}
 0x1d7   :  { %s424_s21 = scalar_lea.hbm %s575_s5, 256 }
 0x1d8   :  { %p425_p9 = scmp.ne.s32.totalorder %s575_s5, %s424_s21  ;;  %p428_p10 = scmp.lt.u32.totalorder %s424_s21, %s575_s5 }
 0x1da   :  { %p430_p11 = pnand %p428_p10, %p425_p9 }
 0x1dc   :  { %433 = shalt.err (!%p430_p11)
}
 0x1dd   :  { %253 = dma.vmem_to_hbm [thread:$0]  %s248_s17, 256, %s575_s5, [#allocation7], %s444_s2, %s444_s2, %s445_s14  }
 0x1de   :  { %440 = dma.done.wait [#allocation7], 256  }
 0x1df   :  { %441 = vsyncadd [#allocation7], 4294967040 }
 0x1e0   :  { %257 = vsyncpa [#allocation6], 1 }
 0x1e1   :  { %258 = vsyncpa [#allocation9], 1 }
 0x1e2   :  { %259 = vsyncpa [#allocation12], 1 }
 0x1e3   :  { %260 = vsyncpa [#allocation7], 1 }

</bundles_post_ra>
